<compile_context>
chip_gen: v6e
topology: v6e:2x2x1
jax: 0.10.0
libtpu: 0.0.40
codegen_flags: <defaults>
</compile_context>

<pallas_src>
import jax
import jax.numpy as jnp
from jax.experimental import pallas as pl
from jax.experimental.pallas import tpu as pltpu

EMBEDDINGS = 8
DENSE = 64
DROPOUT_P = 0.2            # unused in eval-mode forward
MAX_TOKENS_PER_TILE = 16384  # ~16K tokens/grid step: blocks ~0.5-1 MB, h ~4 MB


def _default_pack():
    """16-token packing (128 lanes) by default; 8 on v4/v5-class chips so the
    FLOP inflation stays under their lower compute/bandwidth roofline knee."""
    try:
        kind = jax.devices()[0].device_kind.lower()
    except Exception:
        return 16
    if any(t in kind for t in ("v2", "v3", "v4", "v5")):
        return 8
    return 16


def _ffn_kernel(x_ref, w1_ref, b1_ref, w2_ref, b2_ref, o_ref):
    # x_ref : (TR, PACK*E)        packed tokens, lane-dense
    # w1_ref: (PACK*E, PACK*D)    block-diagonal W1, VMEM-resident
    # b1_ref: (1, PACK*D)
    # w2_ref: (PACK*D, PACK*E)    block-diagonal W2, VMEM-resident
    # b2_ref: (1, PACK*E)
    # o_ref : (TR, PACK*E)
    h = jnp.dot(x_ref[...], w1_ref[...], preferred_element_type=jnp.float32)
    h = jnp.maximum(h + b1_ref[...], 0.0)            # bias bcast + ReLU
    y = jnp.dot(h, w2_ref[...], preferred_element_type=jnp.float32)
    y = y + b2_ref[...]
    # Dropout in eval mode is identity.
    o_ref[...] = y.astype(o_ref.dtype)


def feed_forward(x, w1, b1, w2, b2):
    """x: (B, T, E). w1: (E, DENSE), b1: (DENSE,), w2: (DENSE, E), b2: (E,)."""
    B, T, E = x.shape
    assert E == EMBEDDINGS
    M = B * T

    PACK = _default_pack()
    W_IN = PACK * E          # packed input/output lane width (128 or 64)
    W_H = PACK * DENSE       # packed hidden lane width (1024 or 512)

    # --- activation packing: free contiguous reshape, no HBM transpose ---
    x2d = x.reshape(M, E)
    pad = (-M) % PACK        # only a few tokens at most; usually 0
    if pad:
        x2d = jnp.pad(x2d, ((0, pad), (0, 0)))
    rows = (M + pad) // PACK
    xp = x2d.reshape(rows, W_IN)

    # --- packed (block-diagonal) weights / tiled biases, built once (~1 MB) ---
    eye = jnp.eye(PACK, dtype=w1.dtype)
    w1p = jnp.kron(eye, w1)                      # (W_IN, W_H)
    w2p = jnp.kron(eye, w2)                      # (W_H, W_IN)
    b1p = jnp.tile(b1, PACK).reshape(1, W_H)
    b2p = jnp.tile(b2, PACK).reshape(1, W_IN)

    # --- row-tile selection: big tiles, but keep grid >= 2 when possible ---
    max_tr = max(8, MAX_TOKENS_PER_TILE // PACK)
    if rows > max_tr:
        TR = max_tr                              # multiple of 8
    elif rows >= 16:
        TR = pl.cdiv(pl.cdiv(rows, 2), 8) * 8    # 2 tiles -> both v7x cores
    else:
        TR = rows                                # single full-dim block
    grid_rows = pl.cdiv(rows, TR)                # ragged last tile handled by Pallas

    op = pl.pallas_call(
        _ffn_kernel,
        out_shape=jax.ShapeDtypeStruct((rows, W_IN), x.dtype),
        grid=(grid_rows,),
        in_specs=[
            pl.BlockSpec((TR, W_IN), lambda i: (i, 0)),     # streamed activations
            pl.BlockSpec((W_IN, W_H), lambda i: (0, 0)),    # VMEM-resident weights
            pl.BlockSpec((1, W_H), lambda i: (0, 0)),
            pl.BlockSpec((W_H, W_IN), lambda i: (0, 0)),
            pl.BlockSpec((1, W_IN), lambda i: (0, 0)),
        ],
        out_specs=pl.BlockSpec((TR, W_IN), lambda i: (i, 0)),
        compiler_params=pltpu.CompilerParams(
            dimension_semantics=("parallel",)),             # megacore sharding
    )(xp, w1p, b1p, w2p, b2p)

    # --- unpack: free contiguous reshape back to (B, T, E) ---
    y = op.reshape(rows * PACK, E)
    if pad:
        y = y[:M]
    return y.reshape(B, T, E)


def init_params(key):
    """Deterministic PyTorch-style (Kaiming-uniform-ish) Linear init."""
    k1, k2, k3, k4 = jax.random.split(key, 4)
    bound1 = 1.0 / jnp.sqrt(EMBEDDINGS)
    bound2 = 1.0 / jnp.sqrt(DENSE)
    # Stored as (in_features, out_features) so the reference does x @ W directly.
    w1 = jax.random.uniform(k1, (EMBEDDINGS, DENSE), jnp.float32, -bound1, bound1)
    b1 = jax.random.uniform(k2, (DENSE,), jnp.float32, -bound1, bound1)
    w2 = jax.random.uniform(k3, (DENSE, EMBEDDINGS), jnp.float32, -bound2, bound2)
    b2 = jax.random.uniform(k4, (EMBEDDINGS,), jnp.float32, -bound2, bound2)
    return w1, b1, w2, b2


if __name__ == "__main__":
    key = jax.random.PRNGKey(0)
    k_x, k_p = jax.random.split(key)

    B, T = 2, 8  # batch=2, seq=8, embeddings=8
    x = jax.random.normal(k_x, (B, T, EMBEDDINGS), jnp.float32)
    w1, b1, w2, b2 = init_params(k_p)

    out = jax.block_until_ready(feed_forward(x, w1, b1, w2, b2))

    # sanity check against plain-JAX reference (eval-mode: dropout = identity)
    ref = jnp.maximum(x.reshape(-1, EMBEDDINGS) @ w1 + b1, 0.0) @ w2 + b2
    ref = ref.reshape(B, T, EMBEDDINGS)
    assert out.shape == (B, T, EMBEDDINGS)
    assert jnp.allclose(out, ref, atol=1e-5), "mismatch vs reference"

    print("KERNEL_OK")
</pallas_src>

<mosaic_0001>
module attributes {stable_mosaic.version = 11 : i64} {
  func.func @_ffn_kernel(%arg0: i32, %arg1: memref<1x128xf32, #tpu.memory_space<vmem>>, %arg2: memref<128x1024xf32, #tpu.memory_space<vmem>>, %arg3: memref<1x1024xf32, #tpu.memory_space<vmem>>, %arg4: memref<1024x128xf32, #tpu.memory_space<vmem>>, %arg5: memref<1x128xf32, #tpu.memory_space<vmem>>, %arg6: memref<1x128xf32, #tpu.memory_space<vmem>>) attributes {dimension_semantics = [#tpu.dimension_semantics<parallel>], iteration_bounds = array<i64: 1>, scalar_prefetch = 0 : i64, scratch_operands = 0 : i64, tpu.core_type = #tpu.core_type<tc>, window_params = [{transform_indices = @transform_0, window_bounds = array<i64: 1, 128>}, {pipeline_mode = #tpu.pipeline_mode<synchronous>, transform_indices = @transform_1, window_bounds = array<i64: 128, 1024>}, {pipeline_mode = #tpu.pipeline_mode<synchronous>, transform_indices = @transform_2, window_bounds = array<i64: 1, 1024>}, {pipeline_mode = #tpu.pipeline_mode<synchronous>, transform_indices = @transform_3, window_bounds = array<i64: 1024, 128>}, {pipeline_mode = #tpu.pipeline_mode<synchronous>, transform_indices = @transform_4, window_bounds = array<i64: 1, 128>}, {transform_indices = @transform_5, window_bounds = array<i64: 1, 128>}]} {
    %c0 = arith.constant 0 : index
    %c0_0 = arith.constant 0 : index
    %0 = vector.load %arg1[%c0, %c0_0] : memref<1x128xf32, #tpu.memory_space<vmem>>, vector<1x128xf32>
    %c0_1 = arith.constant 0 : index
    %c0_2 = arith.constant 0 : index
    %1 = vector.load %arg2[%c0_1, %c0_2] : memref<128x1024xf32, #tpu.memory_space<vmem>>, vector<128x1024xf32>
    %cst = arith.constant dense<0.000000e+00> : vector<1x1024xf32>
    %2 = tpu.matmul %0, %1, %cst {dimension_numbers = #tpu.dot_dimension_numbers<[1], [0], [0], [1], [0, 0, 1, 1], [], []>} : vector<1x128xf32>, vector<128x1024xf32>, vector<1x1024xf32> -> vector<1x1024xf32>
    %c0_3 = arith.constant 0 : index
    %c0_4 = arith.constant 0 : index
    %3 = vector.load %arg3[%c0_3, %c0_4] : memref<1x1024xf32, #tpu.memory_space<vmem>>, vector<1x1024xf32>
    %4 = arith.addf %2, %3 : vector<1x1024xf32>
    %cst_5 = arith.constant 0.000000e+00 : f32
    %5 = vector.broadcast %cst_5 : f32 to vector<1x1024xf32>
    %6 = arith.maximumf %4, %5 : vector<1x1024xf32>
    %c0_6 = arith.constant 0 : index
    %c0_7 = arith.constant 0 : index
    %7 = vector.load %arg4[%c0_6, %c0_7] : memref<1024x128xf32, #tpu.memory_space<vmem>>, vector<1024x128xf32>
    %cst_8 = arith.constant dense<0.000000e+00> : vector<1x128xf32>
    %8 = tpu.matmul %6, %7, %cst_8 {dimension_numbers = #tpu.dot_dimension_numbers<[1], [0], [0], [1], [0, 0, 1, 1], [], []>} : vector<1x1024xf32>, vector<1024x128xf32>, vector<1x128xf32> -> vector<1x128xf32>
    %c0_9 = arith.constant 0 : index
    %c0_10 = arith.constant 0 : index
    %9 = vector.load %arg5[%c0_9, %c0_10] : memref<1x128xf32, #tpu.memory_space<vmem>>, vector<1x128xf32>
    %10 = arith.addf %8, %9 : vector<1x128xf32>
    %c0_11 = arith.constant 0 : index
    %c0_12 = arith.constant 0 : index
    %11 = vector.load %arg6[%c0_11, %c0_12] : memref<1x128xf32, #tpu.memory_space<vmem>>, vector<1x128xf32>
    tpu.vector_store %arg6[%c0_11, %c0_12], %10 {strides = array<i32>} : memref<1x128xf32, #tpu.memory_space<vmem>>, vector<1x128xf32>,
    return
  }
  func.func @transform_0(%arg0: i32) -> (i32, i32) {
    %c0_i32 = arith.constant 0 : i32
    %c0_i32_0 = arith.constant 0 : i32
    return %arg0, %c0_i32 : i32, i32
  }
  func.func @transform_1(%arg0: i32) -> (i32, i32) {
    %c0_i32 = arith.constant 0 : i32
    %c0_i32_0 = arith.constant 0 : i32
    %c0_i32_1 = arith.constant 0 : i32
    return %c0_i32, %c0_i32_0 : i32, i32
  }
  func.func @transform_2(%arg0: i32) -> (i32, i32) {
    %c0_i32 = arith.constant 0 : i32
    %c0_i32_0 = arith.constant 0 : i32
    %c0_i32_1 = arith.constant 0 : i32
    return %c0_i32, %c0_i32_0 : i32, i32
  }
  func.func @transform_3(%arg0: i32) -> (i32, i32) {
    %c0_i32 = arith.constant 0 : i32
    %c0_i32_0 = arith.constant 0 : i32
    %c0_i32_1 = arith.constant 0 : i32
    return %c0_i32, %c0_i32_0 : i32, i32
  }
  func.func @transform_4(%arg0: i32) -> (i32, i32) {
    %c0_i32 = arith.constant 0 : i32
    %c0_i32_0 = arith.constant 0 : i32
    %c0_i32_1 = arith.constant 0 : i32
    return %c0_i32, %c0_i32_0 : i32, i32
  }
  func.func @transform_5(%arg0: i32) -> (i32, i32) {
    %c0_i32 = arith.constant 0 : i32
    %c0_i32_0 = arith.constant 0 : i32
    return %arg0, %c0_i32 : i32, i32
  }
}

</mosaic_0001>

<bundles_post_ra>
// kernel: tpu_custom_call.1
= control target key start
LH: loop header
LB: loop body
LE: loop exit
PB: predicated region body
PF: predicated region fallthrough
CT: control target
= control target key end

     0   :  { %10 = vsyncpa [#allocation3], 0  ;;  %s1308_s0 = inlined_call_operand.hbm [shape: f32[1,128], index: 0, kind: input, shape index: {}]   ;;  %s1309_s1 = inlined_call_operand.hbm [shape: f32[128,1024], index: 1, kind: input, shape index: {}]   ;;  %s1310_s2 = inlined_call_operand.hbm [shape: f32[1,1024], index: 2, kind: input, shape index: {}]   ;;  %s1311_s3 = inlined_call_operand.hbm [shape: f32[1024,128], index: 3, kind: input, shape index: {}]   ;;  %s1312_s4 = inlined_call_operand.vmem [shape: f32[1,128], index: 4, kind: input, shape index: {}]   ;;  %s1313_s5 = inlined_call_operand.hbm [shape: f32[1,128], index: 5, kind: output, shape index: {}]  }
   0x1   :  { %11 = vsyncpa [#allocation6], 0 }
   0x2   :  { %12 = vsyncpa [#allocation9], 0 }
   0x3   :  { %13 = vsyncpa [#allocation4], 0  ;;  %s1220_s18 = smov [#allocation5]  }
   0x4   :  { %s29_s19 = sshll.u32 %s1220_s18, 4  ;;  %s30_s19 = int_to_ptr.vmem [resolvable:$true] %s29_s19 }
   0x5   :  { %s1120_s20 = scalar_lea.vmem %s30_s19, 16384  ;;  %p1125_p1 = scmp.lt.s32.totalorder %s30_s19, %s30_s19 }
   0x6   :  { %p1121_p0 = scmp.ne.s32.totalorder %s30_s19, %s1120_s20  ;;  %p1126_p2 = scmp.lt.s32.totalorder %s1120_s20, %s1120_s20 }
   0x8   :  { %p1127_p3 = por %p1126_p2, %p1125_p1 }
   0xa   :  { %p1128_p4 = pnand %p1127_p3, %p1121_p0 }
   0xc   :  { %1131 = shalt.err (!%p1128_p4)
}
   0xd   :  { %s1221_s21 = smov 1024   ;;  %s1222_s22 = smov 64  }
   0xe   :  { %35 = dma.hbm_to_vmem [thread:$0]  %s1309_s1, 16384, %s30_s19, [#allocation6], %s1221_s21, %s1221_s21, %s1222_s22  }
   0xf   :  { %s1223_s25 = smov [#allocation2]   ;;  %s1224_s27 = smov [#allocation7]  }
  0x10   :  { %s20_s26 = sshll.u32 %s1223_s25, 4  ;;  %s42_s28 = sshll.u32 %s1224_s27, 4  ;;  %s21_s26 = int_to_ptr.vmem [resolvable:$true] %s20_s26  ;;  %s43_s28 = int_to_ptr.vmem [resolvable:$true] %s42_s28 }
  0x11   :  { %s1140_s29 = scalar_lea.vmem %s21_s26, 16  ;;  %s1144_s30 = scalar_lea.vmem %s21_s26, 32 }
  0x12   :  { %p1141_p5 = scmp.ne.s32.totalorder %s21_s26, %s1140_s29  ;;  %p1145_p6 = scmp.lt.s32.totalorder %s21_s26, %s21_s26 }
  0x13   :  { %p1146_p7 = scmp.lt.s32.totalorder %s1144_s30, %s1140_s29 }
  0x15   :  { %p1147_p8 = por %p1146_p7, %p1145_p6 }
  0x17   :  { %p1148_p9 = pnand %p1147_p8, %p1141_p5 }
  0x19   :  { %1151 = shalt.err (!%p1148_p9)
}
  0x1a   :  { %23 = dma.hbm_to_vmem [thread:$0]  %s1308_s0, 16, %s21_s26, [#allocation3]  }
  0x1b   :  { %s1160_s8 = scalar_lea.vmem %s43_s28, 128  ;;  %p1165_p11 = scmp.lt.s32.totalorder %s43_s28, %s43_s28 }
  0x1c   :  { %p1161_p10 = scmp.ne.s32.totalorder %s43_s28, %s1160_s8  ;;  %p1166_p12 = scmp.lt.s32.totalorder %s1160_s8, %s1160_s8 }
  0x1e   :  { %p1167_p13 = por %p1166_p12, %p1165_p11 }
  0x20   :  { %p1168_p0 = pnand %p1167_p13, %p1161_p10 }
  0x22   :  { %1171 = shalt.err (!%p1168_p0)
}
  0x23   :  { %45 = dma.hbm_to_vmem [thread:$0]  %s1310_s2, 128, %s43_s28, [#allocation6]  }
  0x24   :  { %s1225_s10 = smov [#allocation8]  }
  0x25   :  { %s51_s11 = sshll.u32 %s1225_s10, 4  ;;  %s52_s11 = int_to_ptr.vmem [resolvable:$true] %s51_s11 }
  0x26   :  { %s1180_s12 = scalar_lea.vmem %s52_s11, 16384  ;;  %p1185_p2 = scmp.lt.s32.totalorder %s52_s11, %s52_s11 }
  0x27   :  { %p1181_p1 = scmp.ne.s32.totalorder %s52_s11, %s1180_s12  ;;  %p1186_p3 = scmp.lt.s32.totalorder %s1180_s12, %s1180_s12 }
  0x29   :  { %p1187_p4 = por %p1186_p3, %p1185_p2 }
  0x2b   :  { %p1188_p5 = pnand %p1187_p4, %p1181_p1 }
  0x2d   :  { %1191 = shalt.err (!%p1188_p5)
}
  0x2e   :  { %s1226_s0 = smov 128   ;;  %s1227_s13 = smov 8  }
  0x2f   :  { %57 = dma.hbm_to_vmem [thread:$0]  %s1311_s3, 16384, %s52_s11, [#allocation9], %s1226_s0, %s1226_s0, %s1227_s13  }
  0x30   :  { %1212 = dma.done.wait [#allocation3], 16  }
  0x31   :  { %1213 = vsyncadd [#allocation3], 4294967280 }
  0x32   :  { %1214 = dma.done.wait [#allocation6], 16512  }
  0x33   :  { %1215 = vsyncadd [#allocation6], 4294950784 }
  0x34   :  { %1216 = dma.done.wait [#allocation9], 16384  }
  0x35   :  { %1217 = vsyncadd [#allocation9], 4294950912  ;;  %v1228_v0 = vmov 0.0   ;;  %v194_v1 = vld [vmem:[#allocation5 + $0x3c8] sm:$0xff]  ;;  %v196_v2 = vld [vmem:[#allocation5 + $0x3d8] sm:$0xff]  ;;  %s1229_s16 = smov [#allocation10]  }
  0x36   :  { %307 = vmatprep.mubr.f32.mxu0 %v1228_v0  ;;  %378 = vmatprep.mubr.f32.mxu1 %v1228_v0  ;;  %v193_v3 = vld [vmem:[#allocation5 + $0x3c0] sm:$0xff]  ;;  %v195_v4 = vld [vmem:[#allocation5 + $0x3d0] sm:$0xff]  ;;  %v186_v5 = vld [vmem:[#allocation5 + $0x388] sm:$0xff]  ;;  %s951_s17 = sshll.u32 %s1229_s16, 4  ;;  %s952_s17 = int_to_ptr.vmem [resolvable:$true] %s951_s17 }
  0x37   :  { %243 = vmatprep.subr.mxu0 %v194_v1  ;;  %314 = vmatprep.subr.mxu1 %v196_v2  ;;  %v188_v6 = vld [vmem:[#allocation5 + $0x398] sm:$0xff]  ;;  %v185_v7 = vld [vmem:[#allocation5 + $0x380] sm:$0xff]  ;;  %v187_v8 = vld [vmem:[#allocation5 + $0x390] sm:$0xff]  ;;  %s1192_s18 = scalar_lea.vmem %s952_s17, 16  ;;  %s1196_s19 = scalar_lea.vmem %s952_s17, 32 }
  0x38   :  { %244 = vmatpush1.msra.mxu0 %v193_v3  ;;  %315 = vmatpush1.msra.mxu1 %v195_v4  ;;  %v178_v9 = vld [vmem:[#allocation5 + $0x348] sm:$0xff]  ;;  %v180_v10 = vld [vmem:[#allocation5 + $0x358] sm:$0xff]  ;;  %v177_v11 = vld [vmem:[#allocation5 + $0x340] sm:$0xff]  ;;  %p1193_p6 = scmp.ne.s32.totalorder %s952_s17, %s1192_s18  ;;  %p1197_p7 = scmp.lt.s32.totalorder %s952_s17, %s952_s17 }
  0x39   :  { %245 = vmatprep.subr.mxu0 %v186_v5  ;;  %316 = vmatprep.subr.mxu1 %v188_v6  ;;  %v179_v12 = vld [vmem:[#allocation5 + $0x350] sm:$0xff]  ;;  %v170_v13 = vld [vmem:[#allocation5 + $0x308] sm:$0xff]  ;;  %v172_v14 = vld [vmem:[#allocation5 + $0x318] sm:$0xff]  ;;  %p1198_p8 = scmp.lt.s32.totalorder %s1196_s19, %s1192_s18 }
  0x3a   :  { %246 = vmatpush1.msra.mxu0 %v185_v7  ;;  %317 = vmatpush1.msra.mxu1 %v187_v8  ;;  %v169_v15 = vld [vmem:[#allocation5 + $0x300] sm:$0xff]  ;;  %v171_v16 = vld [vmem:[#allocation5 + $0x310] sm:$0xff]  ;;  %v162_v17 = vld [vmem:[#allocation5 + $0x2c8] sm:$0xff] }
  0x3b   :  { %247 = vmatprep.subr.mxu0 %v178_v9  ;;  %318 = vmatprep.subr.mxu1 %v180_v10  ;;  %v164_v18 = vld [vmem:[#allocation5 + $0x2d8] sm:$0xff]  ;;  %v161_v19 = vld [vmem:[#allocation5 + $0x2c0] sm:$0xff]  ;;  %v163_v20 = vld [vmem:[#allocation5 + $0x2d0] sm:$0xff]  ;;  %p1199_p9 = por %p1198_p8, %p1197_p7 }
  0x3c   :  { %248 = vmatpush1.msra.mxu0 %v177_v11  ;;  %319 = vmatpush1.msra.mxu1 %v179_v12  ;;  %v154_v21 = vld [vmem:[#allocation5 + $0x288] sm:$0xff]  ;;  %v156_v22 = vld [vmem:[#allocation5 + $0x298] sm:$0xff]  ;;  %v153_v23 = vld [vmem:[#allocation5 + $0x280] sm:$0xff] }
  0x3d   :  { %249 = vmatprep.subr.mxu0 %v170_v13  ;;  %320 = vmatprep.subr.mxu1 %v172_v14  ;;  %v155_v24 = vld [vmem:[#allocation5 + $0x290] sm:$0xff]  ;;  %v146_v25 = vld [vmem:[#allocation5 + $0x248] sm:$0xff]  ;;  %v148_v26 = vld [vmem:[#allocation5 + $0x258] sm:$0xff]  ;;  %p1200_p10 = pnand %p1199_p9, %p1193_p6 }
  0x3e   :  { %250 = vmatpush1.msra.mxu0 %v169_v15  ;;  %321 = vmatpush1.msra.mxu1 %v171_v16  ;;  %v145_v27 = vld [vmem:[#allocation5 + $0x240] sm:$0xff]  ;;  %v147_v28 = vld [vmem:[#allocation5 + $0x250] sm:$0xff]  ;;  %v138_v29 = vld [vmem:[#allocation5 + $0x208] sm:$0xff] }
  0x3f   :  { %251 = vmatprep.subr.mxu0 %v162_v17  ;;  %322 = vmatprep.subr.mxu1 %v164_v18  ;;  %v140_v30 = vld [vmem:[#allocation5 + $0x218] sm:$0xff]  ;;  %v137_v31 = vld [vmem:[#allocation5 + $0x200] sm:$0xff]  ;;  %v139_v32 = vld [vmem:[#allocation5 + $0x210] sm:$0xff] }
  0x40   :  { %252 = vmatpush1.msra.mxu0 %v161_v19  ;;  %323 = vmatpush1.msra.mxu1 %v163_v20  ;;  %v130_v33 = vld [vmem:[#allocation5 + $0x1c8] sm:$0xff]  ;;  %v132_v34 = vld [vmem:[#allocation5 + $0x1d8] sm:$0xff]  ;;  %v129_v35 = vld [vmem:[#allocation5 + $0x1c0] sm:$0xff] }
  0x41   :  { %253 = vmatprep.subr.mxu0 %v154_v21  ;;  %324 = vmatprep.subr.mxu1 %v156_v22  ;;  %v131_v36 = vld [vmem:[#allocation5 + $0x1d0] sm:$0xff]  ;;  %v122_v37 = vld [vmem:[#allocation5 + $0x188] sm:$0xff]  ;;  %v124_v38 = vld [vmem:[#allocation5 + $0x198] sm:$0xff] }
  0x42   :  { %254 = vmatpush1.msra.mxu0 %v153_v23  ;;  %325 = vmatpush1.msra.mxu1 %v155_v24  ;;  %v121_v39 = vld [vmem:[#allocation5 + $0x180] sm:$0xff]  ;;  %v123_v40 = vld [vmem:[#allocation5 + $0x190] sm:$0xff]  ;;  %v114_v41 = vld [vmem:[#allocation5 + $0x148] sm:$0xff] }
  0x43   :  { %255 = vmatprep.subr.mxu0 %v146_v25  ;;  %326 = vmatprep.subr.mxu1 %v148_v26  ;;  %v116_v42 = vld [vmem:[#allocation5 + $0x158] sm:$0xff]  ;;  %v113_v43 = vld [vmem:[#allocation5 + $0x140] sm:$0xff]  ;;  %v115_v44 = vld [vmem:[#allocation5 + $0x150] sm:$0xff] }
  0x44   :  { %256 = vmatpush1.msra.mxu0 %v145_v27  ;;  %327 = vmatpush1.msra.mxu1 %v147_v28  ;;  %v106_v45 = vld [vmem:[#allocation5 + $0x108] sm:$0xff]  ;;  %v108_v46 = vld [vmem:[#allocation5 + $0x118] sm:$0xff]  ;;  %v105_v47 = vld [vmem:[#allocation5 + $0x100] sm:$0xff] }
  0x45   :  { %257 = vmatprep.subr.mxu0 %v138_v29  ;;  %328 = vmatprep.subr.mxu1 %v140_v30  ;;  %v107_v48 = vld [vmem:[#allocation5 + $0x110] sm:$0xff]  ;;  %v98_v49 = vld [vmem:[#allocation5 + $0xc8] sm:$0xff]  ;;  %v100_v50 = vld [vmem:[#allocation5 + $0xd8] sm:$0xff] }
  0x46   :  { %258 = vmatpush1.msra.mxu0 %v137_v31  ;;  %329 = vmatpush1.msra.mxu1 %v139_v32  ;;  %v97_v51 = vld [vmem:[#allocation5 + $0xc0] sm:$0xff]  ;;  %v99_v52 = vld [vmem:[#allocation5 + $0xd0] sm:$0xff]  ;;  %v90_v53 = vld [vmem:[#allocation5 + $0x88] sm:$0xff] }
  0x47   :  { %259 = vmatprep.subr.mxu0 %v130_v33  ;;  %330 = vmatprep.subr.mxu1 %v132_v34  ;;  %v92_v54 = vld [vmem:[#allocation5 + $0x98] sm:$0xff]  ;;  %v89_v55 = vld [vmem:[#allocation5 + $0x80] sm:$0xff]  ;;  %v91_v56 = vld [vmem:[#allocation5 + $0x90] sm:$0xff] }
  0x48   :  { %260 = vmatpush1.msra.mxu0 %v129_v35  ;;  %331 = vmatpush1.msra.mxu1 %v131_v36  ;;  %v82_v57 = vld [vmem:[#allocation5 + $0x48] sm:$0xff]  ;;  %v84_v58 = vld [vmem:[#allocation5 + $0x58] sm:$0xff]  ;;  %v81_v59 = vld [vmem:[#allocation5 + $0x40] sm:$0xff] }
  0x49   :  { %261 = vmatprep.subr.mxu0 %v122_v37  ;;  %332 = vmatprep.subr.mxu1 %v124_v38  ;;  %v83_v60 = vld [vmem:[#allocation5 + $0x50] sm:$0xff]  ;;  %v74_v61 = vld [vmem:[#allocation5 + $0x8] sm:$0xff]  ;;  %v76_v62 = vld [vmem:[#allocation5 + $0x18] sm:$0xff] }
  0x4a   :  { %262 = vmatpush1.msra.mxu0 %v121_v39  ;;  %333 = vmatpush1.msra.mxu1 %v123_v40  ;;  %v73_v63 = vld [vmem:[#allocation5] sm:$0xff]  ;;  %v75_v1 = vld [vmem:[#allocation5 + $0x10] sm:$0xff]  ;;  %v1274_v2 = vld [vmem:[#allocation2] sm:$0x1] }
  0x4b   :  { %263 = vmatprep.subr.mxu0 %v114_v41  ;;  %334 = vmatprep.subr.mxu1 %v116_v42  ;;  %v198_v3 = vld [vmem:[#allocation5 + $0x3e8] sm:$0xff]  ;;  %v200_v4 = vld [vmem:[#allocation5 + $0x3f8] sm:$0xff]  ;;  %v197_v5 = vld [vmem:[#allocation5 + $0x3e0] sm:$0xff] }
  0x4c   :  { %264 = vmatpush1.msra.mxu0 %v113_v43  ;;  %335 = vmatpush1.msra.mxu1 %v115_v44  ;;  %v199_v6 = vld [vmem:[#allocation5 + $0x3f0] sm:$0xff]  ;;  %v190_v7 = vld [vmem:[#allocation5 + $0x3a8] sm:$0xff]  ;;  %v192_v8 = vld [vmem:[#allocation5 + $0x3b8] sm:$0xff] }
  0x4d   :  { %265 = vmatprep.subr.mxu0 %v106_v45  ;;  %336 = vmatprep.subr.mxu1 %v108_v46  ;;  %v189_v9 = vld [vmem:[#allocation5 + $0x3a0] sm:$0xff]  ;;  %v191_v10 = vld [vmem:[#allocation5 + $0x3b0] sm:$0xff]  ;;  %v182_v11 = vld [vmem:[#allocation5 + $0x368] sm:$0xff] }
  0x4e   :  { %266 = vmatpush1.msra.mxu0 %v105_v47  ;;  %337 = vmatpush1.msra.mxu1 %v107_v48  ;;  %v184_v12 = vld [vmem:[#allocation5 + $0x378] sm:$0xff]  ;;  %v181_v13 = vld [vmem:[#allocation5 + $0x360] sm:$0xff]  ;;  %v183_v14 = vld [vmem:[#allocation5 + $0x370] sm:$0xff] }
  0x4f   :  { %267 = vmatprep.subr.mxu0 %v98_v49  ;;  %338 = vmatprep.subr.mxu1 %v100_v50  ;;  %v174_v15 = vld [vmem:[#allocation5 + $0x328] sm:$0xff]  ;;  %v176_v16 = vld [vmem:[#allocation5 + $0x338] sm:$0xff]  ;;  %v173_v17 = vld [vmem:[#allocation5 + $0x320] sm:$0xff] }
  0x50   :  { %268 = vmatpush1.msra.mxu0 %v97_v51  ;;  %339 = vmatpush1.msra.mxu1 %v99_v52  ;;  %v175_v18 = vld [vmem:[#allocation5 + $0x330] sm:$0xff]  ;;  %v166_v19 = vld [vmem:[#allocation5 + $0x2e8] sm:$0xff]  ;;  %v168_v20 = vld [vmem:[#allocation5 + $0x2f8] sm:$0xff] }
  0x51   :  { %269 = vmatprep.subr.mxu0 %v90_v53  ;;  %340 = vmatprep.subr.mxu1 %v92_v54  ;;  %v165_v21 = vld [vmem:[#allocation5 + $0x2e0] sm:$0xff]  ;;  %v167_v22 = vld [vmem:[#allocation5 + $0x2f0] sm:$0xff]  ;;  %v158_v23 = vld [vmem:[#allocation5 + $0x2a8] sm:$0xff] }
  0x52   :  { %270 = vmatpush1.msra.mxu0 %v89_v55  ;;  %341 = vmatpush1.msra.mxu1 %v91_v56  ;;  %v160_v24 = vld [vmem:[#allocation5 + $0x2b8] sm:$0xff]  ;;  %v157_v25 = vld [vmem:[#allocation5 + $0x2a0] sm:$0xff]  ;;  %v159_v26 = vld [vmem:[#allocation5 + $0x2b0] sm:$0xff] }
  0x53   :  { %271 = vmatprep.subr.mxu0 %v82_v57  ;;  %342 = vmatprep.subr.mxu1 %v84_v58  ;;  %v150_v27 = vld [vmem:[#allocation5 + $0x268] sm:$0xff]  ;;  %v152_v28 = vld [vmem:[#allocation5 + $0x278] sm:$0xff]  ;;  %v149_v29 = vld [vmem:[#allocation5 + $0x260] sm:$0xff] }
  0x54   :  { %272 = vmatpush1.msra.mxu0 %v81_v59  ;;  %343 = vmatpush1.msra.mxu1 %v83_v60  ;;  %v151_v30 = vld [vmem:[#allocation5 + $0x270] sm:$0xff]  ;;  %v142_v31 = vld [vmem:[#allocation5 + $0x228] sm:$0xff]  ;;  %v144_v32 = vld [vmem:[#allocation5 + $0x238] sm:$0xff] }
  0x55   :  { %273 = vmatprep.subr.mxu0 %v74_v61  ;;  %344 = vmatprep.subr.mxu1 %v76_v62  ;;  %v141_v33 = vld [vmem:[#allocation5 + $0x220] sm:$0xff]  ;;  %v143_v34 = vld [vmem:[#allocation5 + $0x230] sm:$0xff]  ;;  %v134_v35 = vld [vmem:[#allocation5 + $0x1e8] sm:$0xff] }
  0x56   :  { %274 = vmatpush1.msra.mxu0 %v73_v63  ;;  %345 = vmatpush1.msra.mxu1 %v75_v1  ;;  %v136_v36 = vld [vmem:[#allocation5 + $0x1f8] sm:$0xff]  ;;  %v133_v37 = vld [vmem:[#allocation5 + $0x1e0] sm:$0xff]  ;;  %v135_v38 = vld [vmem:[#allocation5 + $0x1f0] sm:$0xff] }
  0x57   :  { %308 = vmatmul.mubr.f32.vlgmr.msra.gmra.mxu0 %v1274_v2  ;;  %379 = vmatmul.mubr.f32.vlgmr.msra.gmra.mxu1 %v1274_v2  ;;  %v126_v39 = vld [vmem:[#allocation5 + $0x1a8] sm:$0xff]  ;;  %v128_v40 = vld [vmem:[#allocation5 + $0x1b8] sm:$0xff]  ;;  %v125_v41 = vld [vmem:[#allocation5 + $0x1a0] sm:$0xff] }
  0x58   :  { %385 = vmatprep.subr.mxu0 %v198_v3  ;;  %456 = vmatprep.subr.mxu1 %v200_v4  ;;  %v127_v42 = vld [vmem:[#allocation5 + $0x1b0] sm:$0xff]  ;;  %v118_v43 = vld [vmem:[#allocation5 + $0x168] sm:$0xff]  ;;  %v120_v44 = vld [vmem:[#allocation5 + $0x178] sm:$0xff] }
  0x59   :  { %386 = vmatpush1.msra.mxu0 %v197_v5  ;;  %457 = vmatpush1.msra.mxu1 %v199_v6  ;;  %v117_v45 = vld [vmem:[#allocation5 + $0x160] sm:$0xff]  ;;  %v119_v46 = vld [vmem:[#allocation5 + $0x170] sm:$0xff]  ;;  %v110_v47 = vld [vmem:[#allocation5 + $0x128] sm:$0xff] }
  0x5a   :  { %387 = vmatprep.subr.mxu0 %v190_v7  ;;  %458 = vmatprep.subr.mxu1 %v192_v8  ;;  %v112_v48 = vld [vmem:[#allocation5 + $0x138] sm:$0xff]  ;;  %v109_v49 = vld [vmem:[#allocation5 + $0x120] sm:$0xff]  ;;  %v111_v50 = vld [vmem:[#allocation5 + $0x130] sm:$0xff] }
  0x5b   :  { %388 = vmatpush1.msra.mxu0 %v189_v9  ;;  %459 = vmatpush1.msra.mxu1 %v191_v10  ;;  %v102_v51 = vld [vmem:[#allocation5 + $0xe8] sm:$0xff]  ;;  %v104_v52 = vld [vmem:[#allocation5 + $0xf8] sm:$0xff]  ;;  %v101_v53 = vld [vmem:[#allocation5 + $0xe0] sm:$0xff] }
  0x5c   :  { %389 = vmatprep.subr.mxu0 %v182_v11  ;;  %460 = vmatprep.subr.mxu1 %v184_v12  ;;  %v103_v54 = vld [vmem:[#allocation5 + $0xf0] sm:$0xff]  ;;  %v94_v55 = vld [vmem:[#allocation5 + $0xa8] sm:$0xff]  ;;  %v96_v56 = vld [vmem:[#allocation5 + $0xb8] sm:$0xff] }
  0x5d   :  { %390 = vmatpush1.msra.mxu0 %v181_v13  ;;  %461 = vmatpush1.msra.mxu1 %v183_v14  ;;  %v93_v57 = vld [vmem:[#allocation5 + $0xa0] sm:$0xff]  ;;  %v95_v58 = vld [vmem:[#allocation5 + $0xb0] sm:$0xff]  ;;  %v86_v59 = vld [vmem:[#allocation5 + $0x68] sm:$0xff] }
  0x5e   :  { %391 = vmatprep.subr.mxu0 %v174_v15  ;;  %462 = vmatprep.subr.mxu1 %v176_v16  ;;  %v88_v60 = vld [vmem:[#allocation5 + $0x78] sm:$0xff]  ;;  %v85_v61 = vld [vmem:[#allocation5 + $0x60] sm:$0xff]  ;;  %v87_v62 = vld [vmem:[#allocation5 + $0x70] sm:$0xff] }
  0x5f   :  { %392 = vmatpush1.msra.mxu0 %v173_v17  ;;  %463 = vmatpush1.msra.mxu1 %v175_v18  ;;  %v78_v63 = vld [vmem:[#allocation5 + $0x28] sm:$0xff]  ;;  %v80_v1 = vld [vmem:[#allocation5 + $0x38] sm:$0xff]  ;;  %v77_v3 = vld [vmem:[#allocation5 + $0x20] sm:$0xff] }
  0x60   :  { %393 = vmatprep.subr.mxu0 %v166_v19  ;;  %464 = vmatprep.subr.mxu1 %v168_v20  ;;  %v79_v4 = vld [vmem:[#allocation5 + $0x30] sm:$0xff]  ;;  %v566_v5 = vld [vmem:[#allocation8 + $0xf8] sm:$0xff]  ;;  %v565_v9 = vld [vmem:[#allocation8 + $0xf0] sm:$0xff] }
  0x61   :  { %394 = vmatpush1.msra.mxu0 %v165_v21  ;;  %465 = vmatpush1.msra.mxu1 %v167_v22  ;;  %v598_v6 = vld [vmem:[#allocation8 + $0x1f8] sm:$0xff]  ;;  %v597_v10 = vld [vmem:[#allocation8 + $0x1f0] sm:$0xff]  ;;  %v564_v13 = vld [vmem:[#allocation8 + $0xe8] sm:$0xff] }
  0x62   :  { %395 = vmatprep.subr.mxu0 %v158_v23  ;;  %466 = vmatprep.subr.mxu1 %v160_v24  ;;  %v550_v7 = vld [vmem:[#allocation8 + $0x78] sm:$0xff]  ;;  %v549_v11 = vld [vmem:[#allocation8 + $0x70] sm:$0xff]  ;;  %v596_v14 = vld [vmem:[#allocation8 + $0x1e8] sm:$0xff] }
  0x63   :  { %396 = vmatpush1.msra.mxu0 %v157_v25  ;;  %467 = vmatpush1.msra.mxu1 %v159_v26  ;;  %v582_v8 = vld [vmem:[#allocation8 + $0x178] sm:$0xff]  ;;  %v581_v12 = vld [vmem:[#allocation8 + $0x170] sm:$0xff]  ;;  %v548_v15 = vld [vmem:[#allocation8 + $0x68] sm:$0xff] }
  0x64   :  { %397 = vmatprep.subr.mxu0 %v150_v27  ;;  %468 = vmatprep.subr.mxu1 %v152_v28  ;;  %v563_v16 = vld [vmem:[#allocation8 + $0xe0] sm:$0xff]  ;;  %v562_v19 = vld [vmem:[#allocation8 + $0xd8] sm:$0xff]  ;;  %v561_v23 = vld [vmem:[#allocation8 + $0xd0] sm:$0xff] }
  0x65   :  { %398 = vmatpush1.msra.mxu0 %v149_v29  ;;  %469 = vmatpush1.msra.mxu1 %v151_v30  ;;  %v595_v17 = vld [vmem:[#allocation8 + $0x1e0] sm:$0xff]  ;;  %v594_v20 = vld [vmem:[#allocation8 + $0x1d8] sm:$0xff]  ;;  %v593_v24 = vld [vmem:[#allocation8 + $0x1d0] sm:$0xff] }
  0x66   :  { %399 = vmatprep.subr.mxu0 %v142_v31  ;;  %470 = vmatprep.subr.mxu1 %v144_v32  ;;  %v579_v18 = vld [vmem:[#allocation8 + $0x160] sm:$0xff]  ;;  %v546_v21 = vld [vmem:[#allocation8 + $0x58] sm:$0xff]  ;;  %v545_v25 = vld [vmem:[#allocation8 + $0x50] sm:$0xff] }
  0x67   :  { %400 = vmatpush1.msra.mxu0 %v141_v33  ;;  %471 = vmatpush1.msra.mxu1 %v143_v34  ;;  %v578_v22 = vld [vmem:[#allocation8 + $0x158] sm:$0xff]  ;;  %v577_v26 = vld [vmem:[#allocation8 + $0x150] sm:$0xff]  ;;  %v560_v27 = vld [vmem:[#allocation8 + $0xc8] sm:$0xff] }
  0x68   :  { %401 = vmatprep.subr.mxu0 %v134_v35  ;;  %472 = vmatprep.subr.mxu1 %v136_v36  ;;  %v592_v28 = vld [vmem:[#allocation8 + $0x1c8] sm:$0xff]  ;;  %v559_v31 = vld [vmem:[#allocation8 + $0xc0] sm:$0xff]  ;;  %v558_v35 = vld [vmem:[#allocation8 + $0xb8] sm:$0xff] }
  0x69   :  { %402 = vmatpush1.msra.mxu0 %v133_v37  ;;  %473 = vmatpush1.msra.mxu1 %v135_v38  ;;  %v544_v29 = vld [vmem:[#allocation8 + $0x48] sm:$0xff]  ;;  %v591_v32 = vld [vmem:[#allocation8 + $0x1c0] sm:$0xff]  ;;  %v590_v36 = vld [vmem:[#allocation8 + $0x1b8] sm:$0xff] }
  0x6a   :  { %403 = vmatprep.subr.mxu0 %v126_v39  ;;  %474 = vmatprep.subr.mxu1 %v128_v40  ;;  %v576_v30 = vld [vmem:[#allocation8 + $0x148] sm:$0xff]  ;;  %v543_v33 = vld [vmem:[#allocation8 + $0x40] sm:$0xff]  ;;  %v542_v37 = vld [vmem:[#allocation8 + $0x38] sm:$0xff] }
  0x6b   :  { %404 = vmatpush1.msra.mxu0 %v125_v41  ;;  %475 = vmatpush1.msra.mxu1 %v127_v42  ;;  %v575_v34 = vld [vmem:[#allocation8 + $0x140] sm:$0xff]  ;;  %v574_v38 = vld [vmem:[#allocation8 + $0x138] sm:$0xff]  ;;  %v557_v39 = vld [vmem:[#allocation8 + $0xb0] sm:$0xff] }
  0x6c   :  { %405 = vmatprep.subr.mxu0 %v118_v43  ;;  %476 = vmatprep.subr.mxu1 %v120_v44  ;;  %v589_v40 = vld [vmem:[#allocation8 + $0x1b0] sm:$0xff]  ;;  %v556_v43 = vld [vmem:[#allocation8 + $0xa8] sm:$0xff] }
  0x6d   :  { %406 = vmatpush1.msra.mxu0 %v117_v45  ;;  %477 = vmatpush1.msra.mxu1 %v119_v46  ;;  %v541_v41 = vld [vmem:[#allocation8 + $0x30] sm:$0xff]  ;;  %v588_v44 = vld [vmem:[#allocation8 + $0x1a8] sm:$0xff] }
  0x6e   :  { %407 = vmatprep.subr.mxu0 %v110_v47  ;;  %478 = vmatprep.subr.mxu1 %v112_v48  ;;  %v573_v42 = vld [vmem:[#allocation8 + $0x130] sm:$0xff]  ;;  %v540_v45 = vld [vmem:[#allocation8 + $0x28] sm:$0xff]  ;;  %v555_v47 = vld [vmem:[#allocation8 + $0xa0] sm:$0xff] }
  0x6f   :  { %408 = vmatpush1.msra.mxu0 %v109_v49  ;;  %479 = vmatpush1.msra.mxu1 %v111_v50  ;;  %v572_v46 = vld [vmem:[#allocation8 + $0x128] sm:$0xff]  ;;  %v587_v48 = vld [vmem:[#allocation8 + $0x1a0] sm:$0xff] }
  0x70   :  { %409 = vmatprep.subr.mxu0 %v102_v51  ;;  %480 = vmatprep.subr.mxu1 %v104_v52  ;;  %v539_v49 = vld [vmem:[#allocation8 + $0x20] sm:$0xff]  ;;  %v554_v51 = vld [vmem:[#allocation8 + $0x98] sm:$0xff] }
  0x71   :  { %410 = vmatpush1.msra.mxu0 %v101_v53  ;;  %481 = vmatpush1.msra.mxu1 %v103_v54  ;;  %v571_v50 = vld [vmem:[#allocation8 + $0x120] sm:$0xff]  ;;  %v586_v52 = vld [vmem:[#allocation8 + $0x198] sm:$0xff] }
  0x72   :  { %411 = vmatprep.subr.mxu0 %v94_v55  ;;  %482 = vmatprep.subr.mxu1 %v96_v56  ;;  %v538_v53 = vld [vmem:[#allocation8 + $0x18] sm:$0xff]  ;;  %v553_v55 = vld [vmem:[#allocation8 + $0x90] sm:$0xff] }
  0x73   :  { %412 = vmatpush1.msra.mxu0 %v93_v57  ;;  %483 = vmatpush1.msra.mxu1 %v95_v58  ;;  %v570_v54 = vld [vmem:[#allocation8 + $0x118] sm:$0xff]  ;;  %v585_v56 = vld [vmem:[#allocation8 + $0x190] sm:$0xff] }
  0x74   :  { %413 = vmatprep.subr.mxu0 %v86_v59  ;;  %484 = vmatprep.subr.mxu1 %v88_v60  ;;  %v537_v57 = vld [vmem:[#allocation8 + $0x10] sm:$0xff]  ;;  %v552_v59 = vld [vmem:[#allocation8 + $0x88] sm:$0xff] }
  0x75   :  { %414 = vmatpush1.msra.mxu0 %v85_v61  ;;  %485 = vmatpush1.msra.mxu1 %v87_v62  ;;  %v569_v58 = vld [vmem:[#allocation8 + $0x110] sm:$0xff]  ;;  %v584_v60 = vld [vmem:[#allocation8 + $0x188] sm:$0xff] }
  0x76   :  { %415 = vmatprep.subr.mxu0 %v78_v63  ;;  %486 = vmatprep.subr.mxu1 %v80_v1  ;;  %v536_v61 = vld [vmem:[#allocation8 + $0x8] sm:$0xff]  ;;  %v551_v63 = vld [vmem:[#allocation8 + $0x80] sm:$0xff] }
  0x77   :  { %416 = vmatpush1.msra.mxu0 %v77_v3  ;;  %449 = vmatprep.mubr.f32.mxu0 %v1228_v0  ;;  %v568_v62 = vld [vmem:[#allocation8 + $0x108] sm:$0xff]  ;;  %v583_v1 = vld [vmem:[#allocation8 + $0x180] sm:$0xff] }
  0x78   :  { %487 = vmatpush1.msra.mxu1 %v79_v4  ;;  %520 = vmatprep.mubr.f32.mxu1 %v1228_v0  ;;  %v580_v0 = vld [vmem:[#allocation8 + $0x168] sm:$0xff]  ;;  %v535_v3 = vld [vmem:[#allocation8] sm:$0xff] }
  0x79   :  { %450 = vmatmul.mubr.f32.vlgmr.msra.gmra.mxu0 %v1274_v2  ;;  %521 = vmatmul.mubr.f32.vlgmr.msra.gmra.mxu1 %v1274_v2  ;;  %v547_v2 = vld [vmem:[#allocation8 + $0x60] sm:$0xff] }
  0x7a   :  { %962 = vmatprep.subr.mxu0 %v566_v5  ;;  %997 = vmatprep.subr.mxu1 %v598_v6  ;;  %v567_v4 = vld [vmem:[#allocation8 + $0x100] sm:$0xff]  ;;  %v630_v5 = vld [vmem:[#allocation8 + $0x2f8] sm:$0xff] }
  0x7b   :  { %963 = vmatpush3.msra.mxu0 %v550_v7  ;;  %998 = vmatpush3.msra.mxu1 %v582_v8  ;;  %v662_v6 = vld [vmem:[#allocation8 + $0x3f8] sm:$0xff]  ;;  %v203_v7 = vlaneseq }
  0x7c   :  { %964 = vmatprep.subr.mxu0 %v565_v9  ;;  %999 = vmatprep.subr.mxu1 %v597_v10 }
  0x7d   :  { %965 = vmatpush3.msra.mxu0 %v549_v11  ;;  %1000 = vmatpush3.msra.mxu1 %v581_v12  ;;  %v1282_v8 = vshrl.u32 %v203_v7, 7  ;;  %v1286_v11 = vld [vmem:[#allocation7] sm:$0xff]  ;;  %v636_v7 = vld [vmem:[#allocation8 + $0x328] sm:$0xff] }
  0x7e   :  { %966 = vmatprep.subr.mxu0 %v564_v13  ;;  %1001 = vmatprep.subr.mxu1 %v596_v14 }
  0x7f   :  { %967 = vmatpush3.msra.mxu0 %v548_v15  ;;  %1002 = vmatpush3.msra.mxu1 %v580_v0  ;;  %v213_v9 = vsub.s32 2, %v1282_v8  ;;  %v205_v10 = vsub.s32 0, %v1282_v8  ;;  %v209_v12 = vsub.s32 1, %v1282_v8  ;;  %v217_v13 = vsub.s32 3, %v1282_v8 }
  0x80   :  { %968 = vmatprep.subr.mxu0 %v563_v16  ;;  %1003 = vmatprep.subr.mxu1 %v595_v17 }
  0x81   :  { %969 = vmatpush3.msra.mxu0 %v547_v2  ;;  %1004 = vmatpush3.msra.mxu1 %v579_v18  ;;  %v214_v14 = vrot.slane %v1286_v11, %v213_v9  ;;  %v206_v15 = vrot.slane %v1286_v11, %v205_v10  ;;  %v210_v0 = vrot.slane %v1286_v11, %v209_v12  ;;  %v619_v9 = vld [vmem:[#allocation8 + $0x2a0] sm:$0xff]  ;;  %v229_v12 = vsub.s32 6, %v1282_v8 }
  0x82   :  { %970 = vmatprep.subr.mxu0 %v562_v19  ;;  %1005 = vmatprep.subr.mxu1 %v594_v20  ;;  %v218_v16 = vrot.slane %v1286_v11, %v217_v13  ;;  %v651_v10 = vld [vmem:[#allocation8 + $0x3a0] sm:$0xff] }
  0x83   :  { %971 = vmatpush3.msra.mxu0 %v546_v21  ;;  %1006 = vmatpush3.msra.mxu1 %v578_v22  ;;  %v603_v13 = vld [vmem:[#allocation8 + $0x220] sm:$0xff] }
  0x84   :  { %972 = vmatprep.subr.mxu0 %v561_v23  ;;  %1007 = vmatprep.subr.mxu1 %v593_v24 }
  0x85   :  { %973 = vmatpush3.msra.mxu0 %v545_v25  ;;  %1008 = vmatpush3.msra.mxu1 %v577_v26 }
  0x86   :  { %974 = vmatprep.subr.mxu0 %v560_v27  ;;  %1009 = vmatprep.subr.mxu1 %v592_v28  ;;  %v614_v28 = vld [vmem:[#allocation8 + $0x278] sm:$0xff] }
  0x87   :  { %975 = vmatpush3.msra.mxu0 %v544_v29  ;;  %1010 = vmatpush3.msra.mxu1 %v576_v30  ;;  %v646_v29 = vld [vmem:[#allocation8 + $0x378] sm:$0xff]  ;;  %v629_v30 = vld [vmem:[#allocation8 + $0x2f0] sm:$0xff] }
  0x88   :  { %976 = vmatprep.subr.mxu0 %v559_v31  ;;  %1011 = vmatprep.subr.mxu1 %v591_v32  ;;  %v661_v31 = vld [vmem:[#allocation8 + $0x3f0] sm:$0xff] }
  0x89   :  { %977 = vmatpush3.msra.mxu0 %v543_v33  ;;  %1012 = vmatpush3.msra.mxu1 %v575_v34  ;;  %v613_v32 = vld [vmem:[#allocation8 + $0x270] sm:$0xff]  ;;  %v628_v34 = vld [vmem:[#allocation8 + $0x2e8] sm:$0xff] }
  0x8a   :  { %978 = vmatprep.subr.mxu0 %v558_v35  ;;  %1013 = vmatprep.subr.mxu1 %v590_v36  ;;  %v645_v33 = vld [vmem:[#allocation8 + $0x370] sm:$0xff]  ;;  %v660_v35 = vld [vmem:[#allocation8 + $0x3e8] sm:$0xff] }
  0x8b   :  { %979 = vmatpush3.msra.mxu0 %v542_v37  ;;  %1014 = vmatpush3.msra.mxu1 %v574_v38  ;;  %v612_v36 = vld [vmem:[#allocation8 + $0x268] sm:$0xff]  ;;  %v627_v38 = vld [vmem:[#allocation8 + $0x2e0] sm:$0xff] }
  0x8c   :  { %980 = vmatprep.subr.mxu0 %v557_v39  ;;  %1015 = vmatprep.subr.mxu1 %v589_v40  ;;  %v644_v37 = vld [vmem:[#allocation8 + $0x368] sm:$0xff]  ;;  %v659_v39 = vld [vmem:[#allocation8 + $0x3e0] sm:$0xff] }
  0x8d   :  { %981 = vmatpush3.msra.mxu0 %v541_v41  ;;  %1016 = vmatpush3.msra.mxu1 %v573_v42  ;;  %v611_v40 = vld [vmem:[#allocation8 + $0x260] sm:$0xff]  ;;  %v626_v42 = vld [vmem:[#allocation8 + $0x2d8] sm:$0xff] }
  0x8e   :  { %982 = vmatprep.subr.mxu0 %v556_v43  ;;  %1017 = vmatprep.subr.mxu1 %v588_v44  ;;  %v643_v41 = vld [vmem:[#allocation8 + $0x360] sm:$0xff]  ;;  %v658_v43 = vld [vmem:[#allocation8 + $0x3d8] sm:$0xff] }
  0x8f   :  { %983 = vmatpush3.msra.mxu0 %v540_v45  ;;  %1018 = vmatpush3.msra.mxu1 %v572_v46  ;;  %v610_v44 = vld [vmem:[#allocation8 + $0x258] sm:$0xff]  ;;  %v625_v46 = vld [vmem:[#allocation8 + $0x2d0] sm:$0xff] }
  0x90   :  { %984 = vmatprep.subr.mxu0 %v555_v47  ;;  %1019 = vmatprep.subr.mxu1 %v587_v48  ;;  %v642_v45 = vld [vmem:[#allocation8 + $0x358] sm:$0xff]  ;;  %v657_v47 = vld [vmem:[#allocation8 + $0x3d0] sm:$0xff] }
  0x91   :  { %985 = vmatpush3.msra.mxu0 %v539_v49  ;;  %1020 = vmatpush3.msra.mxu1 %v571_v50  ;;  %v609_v48 = vld [vmem:[#allocation8 + $0x250] sm:$0xff]  ;;  %v624_v50 = vld [vmem:[#allocation8 + $0x2c8] sm:$0xff] }
  0x92   :  { %986 = vmatprep.subr.mxu0 %v554_v51  ;;  %1021 = vmatprep.subr.mxu1 %v586_v52  ;;  %v641_v49 = vld [vmem:[#allocation8 + $0x350] sm:$0xff]  ;;  %v656_v51 = vld [vmem:[#allocation8 + $0x3c8] sm:$0xff] }
  0x93   :  { %987 = vmatpush3.msra.mxu0 %v538_v53  ;;  %1022 = vmatpush3.msra.mxu1 %v570_v54  ;;  %v608_v52 = vld [vmem:[#allocation8 + $0x248] sm:$0xff]  ;;  %v623_v54 = vld [vmem:[#allocation8 + $0x2c0] sm:$0xff] }
  0x94   :  { %988 = vmatprep.subr.mxu0 %v553_v55  ;;  %1023 = vmatprep.subr.mxu1 %v585_v56  ;;  %v640_v53 = vld [vmem:[#allocation8 + $0x348] sm:$0xff]  ;;  %v655_v55 = vld [vmem:[#allocation8 + $0x3c0] sm:$0xff] }
  0x95   :  { %989 = vmatpush3.msra.mxu0 %v537_v57  ;;  %1024 = vmatpush3.msra.mxu1 %v569_v58  ;;  %v607_v56 = vld [vmem:[#allocation8 + $0x240] sm:$0xff]  ;;  %v622_v58 = vld [vmem:[#allocation8 + $0x2b8] sm:$0xff] }
  0x96   :  { %990 = vmatprep.subr.mxu0 %v552_v59  ;;  %1025 = vmatprep.subr.mxu1 %v584_v60  ;;  %v639_v57 = vld [vmem:[#allocation8 + $0x340] sm:$0xff]  ;;  %v654_v59 = vld [vmem:[#allocation8 + $0x3b8] sm:$0xff] }
  0x97   :  { %991 = vmatpush3.msra.mxu0 %v536_v61  ;;  %1026 = vmatpush3.msra.mxu1 %v568_v62  ;;  %v606_v60 = vld [vmem:[#allocation8 + $0x238] sm:$0xff]  ;;  %v621_v62 = vld [vmem:[#allocation8 + $0x2b0] sm:$0xff] }
  0x98   :  { %992 = vmatprep.subr.mxu0 %v551_v63  ;;  %1027 = vmatprep.subr.mxu1 %v583_v1  ;;  %v638_v61 = vld [vmem:[#allocation8 + $0x338] sm:$0xff]  ;;  %v653_v63 = vld [vmem:[#allocation8 + $0x3b0] sm:$0xff] }
  0x99   :  { %993 = vmatpush3.msra.mxu0 %v535_v3  ;;  %1028 = vmatpush3.msra.mxu1 %v567_v4  ;;  %v605_v1 = vld [vmem:[#allocation8 + $0x230] sm:$0xff]  ;;  %v620_v4 = vld [vmem:[#allocation8 + $0x2a8] sm:$0xff] }
  0x9a   :  { %1032 = vmatprep.subr.mxu0 %v630_v5  ;;  %1067 = vmatprep.subr.mxu1 %v662_v6  ;;  %v637_v3 = vld [vmem:[#allocation8 + $0x330] sm:$0xff]  ;;  %v652_v5 = vld [vmem:[#allocation8 + $0x3a8] sm:$0xff] }
  0x9b   :  { %v604_v6 = vld [vmem:[#allocation8 + $0x228] sm:$0xff] }
 0x117   :  { %v309_v17 = vpop.f32.mrf.mxu0  ;;  %v380_v2 = vpop.f32.mrf.mxu1 }
 0x118   :  { %v381_v18 = vadd.f32 %v380_v2, %v214_v14  ;;  %v310_v19 = vadd.f32 %v309_v17, %v206_v15  ;;  %v635_v14 = vld [vmem:[#allocation8 + $0x320] sm:$0xff]  ;;  %v221_v15 = vsub.s32 4, %v1282_v8  ;;  %v225_v17 = vsub.s32 5, %v1282_v8 }
 0x119   :  { %v311_v20 = vpop.f32.mrf.mxu0  ;;  %v382_v21 = vpop.f32.mrf.mxu1  ;;  %v233_v2 = vsub.s32 7, %v1282_v8 }
 0x11a   :  { %v312_v22 = vadd.f32 %v311_v20, %v210_v0  ;;  %v383_v23 = vadd.f32 %v382_v21, %v218_v16  ;;  %v529_v24 = vmax.f32 %v381_v18, 0.0  ;;  %v527_v27 = vmax.f32 %v310_v19, 0.0  ;;  %v618_v0 = vld [vmem:[#allocation8 + $0x298] sm:$0xff]  ;;  %v617_v21 = vld [vmem:[#allocation8 + $0x290] sm:$0xff] }
 0x11b   :  { %v650_v16 = vld [vmem:[#allocation8 + $0x398] sm:$0xff]  ;;  %v230_v20 = vrot.slane %v1286_v11, %v229_v12  ;;  %v226_v8 = vrot.slane %v1286_v11, %v225_v17 }
 0x11c   :  { %v528_v25 = vmax.f32 %v312_v22, 0.0  ;;  %v530_v26 = vmax.f32 %v383_v23, 0.0  ;;  %v602_v18 = vld [vmem:[#allocation8 + $0x218] sm:$0xff]  ;;  %v649_v22 = vld [vmem:[#allocation8 + $0x390] sm:$0xff]  ;;  %v222_v23 = vrot.slane %v1286_v11, %v221_v15 }
 0x11d   :  { %v634_v19 = vld [vmem:[#allocation8 + $0x318] sm:$0xff] }
 0x11e   :  { %728 = vmatprep.mubr.f32.mxu0 %v528_v25  ;;  %798 = vmatprep.mubr.f32.mxu1 %v530_v26  ;;  %v633_v25 = vld [vmem:[#allocation8 + $0x310] sm:$0xff]  ;;  %v234_v26 = vrot.slane %v1286_v11, %v233_v2  ;;  %v631_v11 = vld [vmem:[#allocation8 + $0x300] sm:$0xff] }
 0x11f   :  { %729 = vmatmul.mubr.f32.vlgmr.msra.gmra.mxu0 %v527_v27  ;;  %799 = vmatmul.mubr.f32.vlgmr.msra.gmra.mxu1 %v529_v24  ;;  %v601_v24 = vld [vmem:[#allocation8 + $0x210] sm:$0xff]  ;;  %v616_v27 = vld [vmem:[#allocation8 + $0x288] sm:$0xff] }
 0x120   :  { %1033 = vmatpush3.msra.mxu0 %v614_v28  ;;  %1068 = vmatpush3.msra.mxu1 %v646_v29  ;;  %v648_v28 = vld [vmem:[#allocation8 + $0x388] sm:$0xff] }
 0x121   :  { %1034 = vmatprep.subr.mxu0 %v629_v30  ;;  %1069 = vmatprep.subr.mxu1 %v661_v31  ;;  %v600_v31 = vld [vmem:[#allocation8 + $0x208] sm:$0xff] }
 0x122   :  { %1035 = vmatpush3.msra.mxu0 %v613_v32  ;;  %1070 = vmatpush3.msra.mxu1 %v645_v33  ;;  %v632_v32 = vld [vmem:[#allocation8 + $0x308] sm:$0xff] }
 0x123   :  { %1036 = vmatprep.subr.mxu0 %v628_v34  ;;  %1071 = vmatprep.subr.mxu1 %v660_v35  ;;  %v615_v34 = vld [vmem:[#allocation8 + $0x280] sm:$0xff] }
 0x124   :  { %1037 = vmatpush3.msra.mxu0 %v612_v36  ;;  %1072 = vmatpush3.msra.mxu1 %v644_v37  ;;  %v647_v35 = vld [vmem:[#allocation8 + $0x380] sm:$0xff] }
 0x125   :  { %1038 = vmatprep.subr.mxu0 %v627_v38  ;;  %1073 = vmatprep.subr.mxu1 %v659_v39  ;;  %v599_v39 = vld [vmem:[#allocation8 + $0x200] sm:$0xff] }
 0x126   :  { %1039 = vmatpush3.msra.mxu0 %v611_v40  ;;  %1074 = vmatpush3.msra.mxu1 %v643_v41 }
 0x127   :  { %1040 = vmatprep.subr.mxu0 %v626_v42  ;;  %1075 = vmatprep.subr.mxu1 %v658_v43 }
 0x128   :  { %1041 = vmatpush3.msra.mxu0 %v610_v44  ;;  %1076 = vmatpush3.msra.mxu1 %v642_v45 }
 0x129   :  { %1042 = vmatprep.subr.mxu0 %v625_v46  ;;  %1077 = vmatprep.subr.mxu1 %v657_v47 }
 0x12a   :  { %1043 = vmatpush3.msra.mxu0 %v609_v48  ;;  %1078 = vmatpush3.msra.mxu1 %v641_v49 }
 0x12b   :  { %1044 = vmatprep.subr.mxu0 %v624_v50  ;;  %1079 = vmatprep.subr.mxu1 %v656_v51  ;;  %v663_v50 = vld [vmem:[%s1312_s4] sm:$0x1] }
 0x12c   :  { %1045 = vmatpush3.msra.mxu0 %v608_v52  ;;  %1080 = vmatpush3.msra.mxu1 %v640_v53 }
 0x12d   :  { %1046 = vmatprep.subr.mxu0 %v623_v54  ;;  %1081 = vmatprep.subr.mxu1 %v655_v55 }
 0x12e   :  { %1047 = vmatpush3.msra.mxu0 %v607_v56  ;;  %1082 = vmatpush3.msra.mxu1 %v639_v57 }
 0x12f   :  { %1048 = vmatprep.subr.mxu0 %v622_v58  ;;  %1083 = vmatprep.subr.mxu1 %v654_v59 }
 0x130   :  { %1049 = vmatpush3.msra.mxu0 %v606_v60  ;;  %1084 = vmatpush3.msra.mxu1 %v638_v61 }
 0x131   :  { %1050 = vmatprep.subr.mxu0 %v621_v62  ;;  %1085 = vmatprep.subr.mxu1 %v653_v63 }
 0x132   :  { %1051 = vmatpush3.msra.mxu0 %v605_v1  ;;  %1086 = vmatpush3.msra.mxu1 %v637_v3 }
 0x133   :  { %1052 = vmatprep.subr.mxu0 %v620_v4  ;;  %1087 = vmatprep.subr.mxu1 %v652_v5 }
 0x134   :  { %1053 = vmatpush3.msra.mxu0 %v604_v6  ;;  %1088 = vmatpush3.msra.mxu1 %v636_v7 }
 0x135   :  { %1054 = vmatprep.subr.mxu0 %v619_v9  ;;  %1089 = vmatprep.subr.mxu1 %v651_v10 }
 0x136   :  { %1055 = vmatpush3.msra.mxu0 %v603_v13  ;;  %1090 = vmatpush3.msra.mxu1 %v635_v14 }
 0x137   :  { %1056 = vmatprep.subr.mxu0 %v618_v0  ;;  %1091 = vmatprep.subr.mxu1 %v650_v16 }
 0x138   :  { %1057 = vmatpush3.msra.mxu0 %v602_v18  ;;  %1092 = vmatpush3.msra.mxu1 %v634_v19 }
 0x139   :  { %v451_v29 = vpop.f32.mrf.mxu0  ;;  %v522_v30 = vpop.f32.mrf.mxu1  ;;  %1058 = vmatprep.subr.mxu0 %v617_v21  ;;  %1093 = vmatprep.subr.mxu1 %v649_v22 }
 0x13a   :  { %v523_v33 = vadd.f32 %v522_v30, %v230_v20  ;;  %1059 = vmatpush3.msra.mxu0 %v601_v24  ;;  %1094 = vmatpush3.msra.mxu1 %v633_v25  ;;  %v452_v36 = vadd.f32 %v451_v29, %v222_v23 }
 0x13b   :  { %v453_v37 = vpop.f32.mrf.mxu0  ;;  %v524_v38 = vpop.f32.mrf.mxu1  ;;  %1060 = vmatprep.subr.mxu0 %v616_v27  ;;  %1095 = vmatprep.subr.mxu1 %v648_v28 }
 0x13c   :  { %v454_v40 = vadd.f32 %v453_v37, %v226_v8  ;;  %v525_v41 = vadd.f32 %v524_v38, %v234_v26  ;;  %1061 = vmatpush3.msra.mxu0 %v600_v31  ;;  %1096 = vmatpush3.msra.mxu1 %v632_v32  ;;  %v533_v42 = vmax.f32 %v523_v33, 0.0  ;;  %v531_v45 = vmax.f32 %v452_v36, 0.0 }
 0x13d   :  { %1062 = vmatprep.subr.mxu0 %v615_v34  ;;  %1097 = vmatprep.subr.mxu1 %v647_v35 }
 0x13e   :  { %v532_v43 = vmax.f32 %v454_v40, 0.0  ;;  %v534_v44 = vmax.f32 %v525_v41, 0.0  ;;  %1063 = vmatpush3.msra.mxu0 %v599_v39  ;;  %1098 = vmatpush3.msra.mxu1 %v631_v11 }
 0x140   :  { %868 = vmatprep.mubr.f32.mxu0 %v532_v43  ;;  %938 = vmatprep.mubr.f32.mxu1 %v534_v44 }
 0x141   :  { %869 = vmatmul.mubr.f32.vlgmr.msra.gmra.mxu0 %v531_v45  ;;  %939 = vmatmul.mubr.f32.vlgmr.msra.gmra.mxu1 %v533_v42 }
 0x1df   :  { %v994_v46 = vpop.f32.mrf.mxu0  ;;  %v1029_v48 = vpop.f32.mrf.mxu1 }
 0x1e1   :  { %v995_v47 = vpop.f32.mrf.mxu0  ;;  %v1030_v51 = vpop.f32.mrf.mxu1 }
 0x1e2   :  { %v996_v49 = vadd.f32 %v995_v47, %v994_v46  ;;  %v1031_v55 = vadd.f32 %v1030_v51, %v1029_v48 }
 0x1e4   :  { %v731_v52 = vadd.f32 %v996_v49, %v663_v50 }
 0x1e6   :  { %v801_v58 = vadd.f32 %v1031_v55, %v731_v52 }
 0x201   :  { %v1064_v53 = vpop.f32.mrf.mxu0  ;;  %v1099_v54 = vpop.f32.mrf.mxu1 }
 0x203   :  { %v1065_v56 = vpop.f32.mrf.mxu0  ;;  %v1100_v57 = vpop.f32.mrf.mxu1 }
 0x204   :  { %v1066_v59 = vadd.f32 %v1065_v56, %v1064_v53  ;;  %v1101_v61 = vadd.f32 %v1100_v57, %v1099_v54 }
 0x206   :  { %v871_v60 = vadd.f32 %v1066_v59, %v801_v58 }
 0x208   :  { %v941_v62 = vadd.f32 %v1101_v61, %v871_v60 }
 0x20a   :  { %944 = vst [vmem:[#allocation10] sm:$0x1] %v941_v62 }
 0x20b   :  { %1203 = shalt.err (!%p1200_p10)
}
 0x20c   :  { %954 = dma.vmem_to_hbm [thread:$0]  %s952_s17, 16, %s1313_s5, [#allocation4]  }
 0x20d   :  { %1218 = dma.done.wait [#allocation4], 16  }
 0x20e   :  { %1219 = vsyncadd [#allocation4], 4294967280 }
 0x20f   :  { %958 = vsyncpa [#allocation3], 1 }
 0x210   :  { %959 = vsyncpa [#allocation6], 1 }
 0x211   :  { %960 = vsyncpa [#allocation9], 1 }
 0x212   :  { %961 = vsyncpa [#allocation4], 1 }

</bundles_post_ra>
